<compile_context>
chip_gen: v7x
topology: tpu7x:2x2x1
jax: 0.10.0
libtpu: 0.0.40
codegen_flags: <defaults>
</compile_context>

<pallas_src>
import math

import jax
import jax.numpy as jnp
from jax.experimental import pallas as pl
from jax.experimental.pallas import tpu as pltpu


def net_inprocess_kernel(
    x_ref,    # (tile, 16)  [input features | sensitive]
    w1_ref,   # (16, 10)    fc1 weight (in x out), row 15 = 0
    b1_ref,   # (1, 10)     fc1 bias
    wd_ref,   # (10, 2)     [fc2 w[:,1]-w[:,0] | fc3 w[:10,1]-w[:10,0]]
    bd_ref,   # (1, 2)      [fc2 b1-b0 | fc3 b1-b0]
    sd_ref,   # (1, 2)      [0 | fc3 w[10,1]-w[10,0]]  (sensitive diff)
    out_ref,  # (tile, 4)   [softmax(output_p) | softmax(output_a)]
):
    x = x_ref[...].astype(jnp.float32)                      # (tile, 16)

    # fc1 + ReLU  (one MXU matmul: K=16, N=10; padded row contributes 0)
    h = jnp.dot(x, w1_ref[...], preferred_element_type=jnp.float32) + b1_ref[...]
    h = jnp.maximum(h, 0.0)                                 # (tile, 10)

    # Fused logit differences d = z1 - z0 for both heads (N=2 matmul);
    # sensitive term is a VPU broadcast multiply on column 15 of x.
    s = x[:, 15:16]                                         # (tile, 1)
    d = (jnp.dot(h, wd_ref[...], preferred_element_type=jnp.float32)
         + bd_ref[...]
         + s * sd_ref[...])                                 # (tile, 2)

    # Exact 2-class softmax in sigmoid form (no XLU max/sum, no approx recip).
    p0 = 1.0 / (1.0 + jnp.exp(d))                           # (tile, 2)

    out_ref[...] = jnp.concatenate(
        [p0[:, 0:1], 1.0 - p0[:, 0:1], p0[:, 1:2], 1.0 - p0[:, 1:2]], axis=1)


def _round_up(n, m):
    return ((n + m - 1) // m) * m


def net_inprocess_forward(x, sensitive, params, *, block_b=4096):
    """Fused forward pass. Returns (softmax(output_p), softmax(output_a))."""
    B = x.shape[0]
    s = sensitive.reshape(B, -1).astype(x.dtype)

    # Pack sensitive as a 16th feature column: one input stream, clean 64 B row.
    # TODO(synk): ideally the producer emits x already packed this way (and/or
    # feature-major); this concat is one extra HBM pass over x.
    x16 = jnp.concatenate([x, s], axis=1)                   # (B, 16)

    # Weight packing / fusion (layout plumbing, outside the kernel).
    w1 = params["w1"]                                       # (15, 10)
    w1p = jnp.concatenate([w1, jnp.zeros((1, 10), w1.dtype)], axis=0)  # (16, 10)
    b1 = params["b1"].reshape(1, -1)                        # (1, 10)
    w2, b2 = params["w2"], params["b2"]                     # (10, 2), (2,)
    w3, b3 = params["w3"], params["b3"]                     # (11, 2), (2,)
    wd = jnp.stack([w2[:, 1] - w2[:, 0], w3[:10, 1] - w3[:10, 0]], axis=1)  # (10, 2)
    bd = jnp.stack([b2[1] - b2[0], b3[1] - b3[0]]).reshape(1, 2)            # (1, 2)
    sd = jnp.stack([jnp.zeros((), w3.dtype), w3[10, 1] - w3[10, 0]]).reshape(1, 2)

    # Batch tile: as large as block_b (amortizes per-step overhead), but keep
    # >= 2 (even) grid steps when possible so both v7x TensorCores get work.
    n_steps = max(1, pl.cdiv(B, block_b))
    if B > 8 and n_steps == 1:
        n_steps = 2
    if n_steps > 1 and n_steps % 2:
        n_steps += 1
    tile = max(8, _round_up(pl.cdiv(B, n_steps), 8))
    grid = (pl.cdiv(B, tile),)                              # ragged last block OK

    def const_spec(arr):
        return pl.BlockSpec(arr.shape, lambda i: (0, 0))    # resident across steps

    packed = pl.pallas_call(
        net_inprocess_kernel,
        out_shape=jax.ShapeDtypeStruct((B, 4), jnp.float32),
        grid=grid,
        in_specs=[
            pl.BlockSpec((tile, 16), lambda i: (i, 0)),     # x (pipelined)
            const_spec(w1p),
            const_spec(b1),
            const_spec(wd),
            const_spec(bd),
            const_spec(sd),
        ],
        out_specs=pl.BlockSpec((tile, 4), lambda i: (i, 0)),
        compiler_params=pltpu.CompilerParams(
            dimension_semantics=("parallel",)),             # split batch on v7x TCs
    )(x16, w1p, b1, wd, bd, sd)

    return packed[:, 0:2], packed[:, 2:4]


def init_params(key):
    """nn.Linear-style init (uniform +-1/sqrt(fan_in)); weights stored (in, out)."""
    def linear(k, fan_in, fan_out):
        kw, kb = jax.random.split(k)
        bound = 1.0 / math.sqrt(fan_in)
        w = jax.random.uniform(kw, (fan_in, fan_out), jnp.float32, -bound, bound)
        b = jax.random.uniform(kb, (fan_out,), jnp.float32, -bound, bound)
        return w, b

    k1, k2, k3 = jax.random.split(key, 3)
    w1, b1 = linear(k1, 15, 10)
    w2, b2 = linear(k2, 10, 2)
    w3, b3 = linear(k3, 11, 2)
    return {"w1": w1, "b1": b1, "w2": w2, "b2": b2, "w3": w3, "b3": b3}


def reference_forward(x, sensitive, params):
    x = x.astype(jnp.float32)
    s = sensitive.reshape(x.shape[0], -1).astype(jnp.float32)
    h = jax.nn.relu(x @ params["w1"] + params["b1"])
    out_p = h @ params["w2"] + params["b2"]
    out_a = jnp.concatenate([h, s], axis=1) @ params["w3"] + params["b3"]
    return jax.nn.softmax(out_p, axis=1), jax.nn.softmax(out_a, axis=1)


def _check(B, kx, ks, params, atol):
    x = jax.random.normal(kx, (B, 15), jnp.float32)
    sensitive = jax.random.bernoulli(ks, 0.5, (B, 1)).astype(jnp.float32)
    out_p, out_a = net_inprocess_forward(x, sensitive, params)
    jax.block_until_ready((out_p, out_a))
    ref_p, ref_a = reference_forward(x, sensitive, params)
    assert out_p.shape == (B, 2) and out_a.shape == (B, 2)
    assert jnp.allclose(out_p, ref_p, atol=atol), "output_p mismatch"
    assert jnp.allclose(out_a, ref_a, atol=atol), "output_a mismatch"
    assert jnp.allclose(out_p.sum(axis=1), 1.0, atol=1e-5)
    assert jnp.allclose(out_a.sum(axis=1), 1.0, atol=1e-5)


if __name__ == "__main__":
    key = jax.random.PRNGKey(0)
    kx, ks, kp, kx2, ks2 = jax.random.split(key, 5)
    params = init_params(kp)

    # Small shape from the module spec (B=8, 15 features, 1 sensitive bit).
    _check(8, kx, ks, params, atol=2e-3)
    # Larger batch: exercises multi-step grid + ragged last block (no padding).
    _check(1000, kx2, ks2, params, atol=2e-3)

    print("KERNEL_OK")
</pallas_src>

<mosaic_0001>
module attributes {stable_mosaic.version = 11 : i64} {
  func.func @net_inprocess_kernel(%arg0: i32, %arg1: memref<8x16xf32, #tpu.memory_space<vmem>>, %arg2: memref<16x10xf32, #tpu.memory_space<vmem>>, %arg3: memref<1x10xf32, #tpu.memory_space<vmem>>, %arg4: memref<10x2xf32, #tpu.memory_space<vmem>>, %arg5: memref<1x2xf32, #tpu.memory_space<vmem>>, %arg6: memref<1x2xf32, #tpu.memory_space<vmem>>, %arg7: memref<8x4xf32, #tpu.memory_space<vmem>>) attributes {dimension_semantics = [#tpu.dimension_semantics<parallel>], iteration_bounds = array<i64: 1>, scalar_prefetch = 0 : i64, scratch_operands = 0 : i64, tpu.core_type = #tpu.core_type<tc>, window_params = [{transform_indices = @transform_0, window_bounds = array<i64: 8, 16>}, {pipeline_mode = #tpu.pipeline_mode<synchronous>, transform_indices = @transform_1, window_bounds = array<i64: 16, 10>}, {pipeline_mode = #tpu.pipeline_mode<synchronous>, transform_indices = @transform_2, window_bounds = array<i64: 1, 10>}, {pipeline_mode = #tpu.pipeline_mode<synchronous>, transform_indices = @transform_3, window_bounds = array<i64: 10, 2>}, {pipeline_mode = #tpu.pipeline_mode<synchronous>, transform_indices = @transform_4, window_bounds = array<i64: 1, 2>}, {pipeline_mode = #tpu.pipeline_mode<synchronous>, transform_indices = @transform_5, window_bounds = array<i64: 1, 2>}, {transform_indices = @transform_6, window_bounds = array<i64: 8, 4>}]} {
    %c0 = arith.constant 0 : index
    %c0_0 = arith.constant 0 : index
    %0 = vector.load %arg1[%c0, %c0_0] : memref<8x16xf32, #tpu.memory_space<vmem>>, vector<8x16xf32>
    %c0_1 = arith.constant 0 : index
    %c0_2 = arith.constant 0 : index
    %1 = vector.load %arg2[%c0_1, %c0_2] : memref<16x10xf32, #tpu.memory_space<vmem>>, vector<16x10xf32>
    %cst = arith.constant dense<0.000000e+00> : vector<8x10xf32>
    %2 = tpu.matmul %0, %1, %cst {dimension_numbers = #tpu.dot_dimension_numbers<[1], [0], [0], [1], [0, 0, 1, 1], [], []>} : vector<8x16xf32>, vector<16x10xf32>, vector<8x10xf32> -> vector<8x10xf32>
    %c0_3 = arith.constant 0 : index
    %c0_4 = arith.constant 0 : index
    %3 = vector.load %arg3[%c0_3, %c0_4] : memref<1x10xf32, #tpu.memory_space<vmem>>, vector<1x10xf32>
    %4 = vector.broadcast %3 : vector<1x10xf32> to vector<8x10xf32>
    %5 = arith.addf %2, %4 : vector<8x10xf32>
    %cst_5 = arith.constant 0.000000e+00 : f32
    %6 = vector.broadcast %cst_5 : f32 to vector<8x10xf32>
    %7 = arith.maximumf %5, %6 : vector<8x10xf32>
    %8 = vector.extract_strided_slice %0 {offsets = [0, 15], sizes = [8, 1], strides = [1, 1]} : vector<8x16xf32> to vector<8x1xf32>
    %c0_6 = arith.constant 0 : index
    %c0_7 = arith.constant 0 : index
    %9 = vector.load %arg4[%c0_6, %c0_7] : memref<10x2xf32, #tpu.memory_space<vmem>>, vector<10x2xf32>
    %cst_8 = arith.constant dense<0.000000e+00> : vector<8x2xf32>
    %10 = tpu.matmul %7, %9, %cst_8 {dimension_numbers = #tpu.dot_dimension_numbers<[1], [0], [0], [1], [0, 0, 1, 1], [], []>} : vector<8x10xf32>, vector<10x2xf32>, vector<8x2xf32> -> vector<8x2xf32>
    %c0_9 = arith.constant 0 : index
    %c0_10 = arith.constant 0 : index
    %11 = vector.load %arg5[%c0_9, %c0_10] : memref<1x2xf32, #tpu.memory_space<vmem>>, vector<1x2xf32>
    %12 = vector.broadcast %11 : vector<1x2xf32> to vector<8x2xf32>
    %13 = arith.addf %10, %12 : vector<8x2xf32>
    %c0_11 = arith.constant 0 : index
    %c0_12 = arith.constant 0 : index
    %14 = vector.load %arg6[%c0_11, %c0_12] : memref<1x2xf32, #tpu.memory_space<vmem>>, vector<1x2xf32>
    %15 = vector.broadcast %8 : vector<8x1xf32> to vector<8x2xf32>
    %16 = vector.broadcast %14 : vector<1x2xf32> to vector<8x2xf32>
    %17 = arith.mulf %15, %16 : vector<8x2xf32>
    %18 = arith.addf %13, %17 : vector<8x2xf32>
    %19 = math.exp %18 : vector<8x2xf32>
    %cst_13 = arith.constant 1.000000e+00 : f32
    %20 = vector.broadcast %cst_13 : f32 to vector<8x2xf32>
    %21 = arith.addf %20, %19 : vector<8x2xf32>
    %cst_14 = arith.constant 1.000000e+00 : f32
    %22 = vector.broadcast %cst_14 : f32 to vector<8x2xf32>
    %23 = arith.divf %22, %21 : vector<8x2xf32>
    %24 = vector.extract_strided_slice %23 {offsets = [0, 0], sizes = [8, 1], strides = [1, 1]} : vector<8x2xf32> to vector<8x1xf32>
    %25 = vector.extract_strided_slice %23 {offsets = [0, 0], sizes = [8, 1], strides = [1, 1]} : vector<8x2xf32> to vector<8x1xf32>
    %cst_15 = arith.constant 1.000000e+00 : f32
    %26 = vector.broadcast %cst_15 : f32 to vector<8x1xf32>
    %27 = arith.subf %26, %25 : vector<8x1xf32>
    %28 = vector.extract_strided_slice %23 {offsets = [0, 1], sizes = [8, 1], strides = [1, 1]} : vector<8x2xf32> to vector<8x1xf32>
    %29 = vector.extract_strided_slice %23 {offsets = [0, 1], sizes = [8, 1], strides = [1, 1]} : vector<8x2xf32> to vector<8x1xf32>
    %cst_16 = arith.constant 1.000000e+00 : f32
    %30 = vector.broadcast %cst_16 : f32 to vector<8x1xf32>
    %31 = arith.subf %30, %29 : vector<8x1xf32>
    %32 = tpu.concatenate %24, %27, %28, %31 in 1 : vector<8x1xf32>, vector<8x1xf32>, vector<8x1xf32>, vector<8x1xf32> -> vector<8x4xf32>
    %c0_17 = arith.constant 0 : index
    %c0_18 = arith.constant 0 : index
    %33 = vector.load %arg7[%c0_17, %c0_18] : memref<8x4xf32, #tpu.memory_space<vmem>>, vector<8x4xf32>
    tpu.vector_store %arg7[%c0_17, %c0_18], %32 {strides = array<i32>} : memref<8x4xf32, #tpu.memory_space<vmem>>, vector<8x4xf32>,
    return
  }
  func.func @transform_0(%arg0: i32) -> (i32, i32) {
    %c0_i32 = arith.constant 0 : i32
    %c0_i32_0 = arith.constant 0 : i32
    return %arg0, %c0_i32 : i32, i32
  }
  func.func @transform_1(%arg0: i32) -> (i32, i32) {
    %c0_i32 = arith.constant 0 : i32
    %c0_i32_0 = arith.constant 0 : i32
    %c0_i32_1 = arith.constant 0 : i32
    return %c0_i32, %c0_i32_0 : i32, i32
  }
  func.func @transform_2(%arg0: i32) -> (i32, i32) {
    %c0_i32 = arith.constant 0 : i32
    %c0_i32_0 = arith.constant 0 : i32
    %c0_i32_1 = arith.constant 0 : i32
    return %c0_i32, %c0_i32_0 : i32, i32
  }
  func.func @transform_3(%arg0: i32) -> (i32, i32) {
    %c0_i32 = arith.constant 0 : i32
    %c0_i32_0 = arith.constant 0 : i32
    %c0_i32_1 = arith.constant 0 : i32
    return %c0_i32, %c0_i32_0 : i32, i32
  }
  func.func @transform_4(%arg0: i32) -> (i32, i32) {
    %c0_i32 = arith.constant 0 : i32
    %c0_i32_0 = arith.constant 0 : i32
    %c0_i32_1 = arith.constant 0 : i32
    return %c0_i32, %c0_i32_0 : i32, i32
  }
  func.func @transform_5(%arg0: i32) -> (i32, i32) {
    %c0_i32 = arith.constant 0 : i32
    %c0_i32_0 = arith.constant 0 : i32
    %c0_i32_1 = arith.constant 0 : i32
    return %c0_i32, %c0_i32_0 : i32, i32
  }
  func.func @transform_6(%arg0: i32) -> (i32, i32) {
    %c0_i32 = arith.constant 0 : i32
    %c0_i32_0 = arith.constant 0 : i32
    return %arg0, %c0_i32 : i32, i32
  }
}

</mosaic_0001>

<bundles_post_ra>
// kernel: tpu_custom_call.1
= control target key start
LH: loop header
LB: loop body
LE: loop exit
PB: predicated region body
PF: predicated region fallthrough
CT: control target
= control target key end

     0   :  { %11 = vsyncpa [#allocation3], 0  ;;  %s320_s21 = smov [#allocation2]   ;;  %s399_s0 = inlined_call_operand.hbm [shape: f32[8,16], index: 0, kind: input, shape index: {}]   ;;  %s400_s1 = inlined_call_operand.vmem [shape: f32[16,10], index: 1, kind: input, shape index: {}]   ;;  %s401_s2 = inlined_call_operand.vmem [shape: f32[1,10], index: 2, kind: input, shape index: {}]   ;;  %s402_s3 = inlined_call_operand.vmem [shape: f32[10,2], index: 3, kind: input, shape index: {}]   ;;  %s403_s4 = inlined_call_operand.vmem [shape: f32[1,2], index: 4, kind: input, shape index: {}]   ;;  %s404_s5 = inlined_call_operand.vmem [shape: f32[1,2], index: 5, kind: input, shape index: {}]   ;;  %s405_s6 = inlined_call_operand.vmem [shape: f32[8,4], index: 6, kind: output, shape index: {}]  }
   0x1   :  { %s18_s22 = sshll.u32 %s320_s21, 4  ;;  %s296_s25 = scalar_lea.hbm %s399_s0, 128  ;;  %s19_s22 = int_to_ptr.vmem [resolvable:$true] %s18_s22 }
   0x2   :  { %p297_p0 = scmp.ne.s32.totalorder %s399_s0, %s296_s25  ;;  %p300_p1 = scmp.lt.u32.totalorder %s296_s25, %s399_s0 }
   0x4   :  { %p302_p2 = pnand %p300_p1, %p297_p0 }
   0x6   :  { %305 = shalt.err (!%p302_p2)
}
   0x7   :  { %s306_s30 = scalar_lea.vmem %s19_s22, 128  ;;  %p311_p4 = scmp.lt.s32.totalorder %s19_s22, %s19_s22 }
   0x8   :  { %p307_p3 = scmp.ne.s32.totalorder %s19_s22, %s306_s30  ;;  %p312_p5 = scmp.lt.s32.totalorder %s306_s30, %s306_s30 }
   0xa   :  { %p313_p6 = por %p312_p5, %p311_p4 }
   0xc   :  { %p314_p7 = pnand %p313_p6, %p307_p3 }
   0xe   :  { %317 = shalt.err (!%p314_p7)
}
   0xf   :  { %21 = dma.hbm_to_vmem [thread:$0]  %s399_s0, 128, %s19_s22, [#allocation3]  }
  0x10   :  { %318 = dma.done.wait [#allocation3], 128  }
  0x11   :  { %319 = vsyncadd [#allocation3], 4294967168  ;;  %v321_v0 = vmov 0.0|0.0   ;;  %vm322_vm0 = vmmov 0   ;;  %v323_v1 = vmov 0.0   ;;  %v36_v2 = vld [vmem:[%s400_s1] sm:$0xff] }
  0x12   :  { %276 = vmatprep.subr.bf16.mxu0 %v321_v0  ;;  %266 = vmatprep.mubr.msk.f32.mxu0 %vm322_vm0, %v323_v1  ;;  %v37_v3 = vld [vmem:[%s400_s1 + $0x8] sm:$0xff]  ;;  %v35_v5 = vld [vmem:[#allocation2] sm:$0xff]  ;;  %vm45_vm1 = vcmask 130048   ;;  %vm133_vm2 = vcmask 1041408   ;;  %vm324_vm3 = vmmov 1   ;;  %v325_v9 = vmov 15  }
  0x13   :  { %279 = vmatprep.subr.bf16.mxu1 %v321_v0  ;;  %273 = vmatprep.mubr.msk.f32.mxu1 %vm322_vm0, %v323_v1  ;;  %v277_v4 = vpack.c.bf16 %v37_v3, %v36_v2  ;;  %v120_v6 = vld [vmem:[%s402_s3] sm:$0xff]  ;;  %v121_v7 = vld [vmem:[%s402_s3 + $0x8] sm:$0x3]  ;;  %vm281_vm4 = vmpackc.low %vm133_vm2, %vm324_vm3  ;;  %vm129_vm5 = vcmask 80896   ;;  %vm237_vm6 = vcmask 7168   ;;  %vm239_vm7 = vcmask 15360  }
  0x14   :  { %v280_v8 = vpack.c.bf16 %v121_v7, %v120_v6  ;;  %291 = vset.pattern.permute.xlu0 %v325_v9  ;;  %v250_v10 = vld [vmem:[%s401_s2] ss:$0 sm:$0xff]  ;;  %s326_s2 = smov 1   ;;  %vm241_vm8 = vcmask 23552   ;;  %vm243_vm9 = vcmask 31744  }
  0x15   :  { %278 = vmatpush3.bf16.msra.mxu0 %v277_v4  ;;  %209 = vperm.xlu0 %291, %v35_v5   ;;  %v255_v15 = vld [vmem:[%s404_s5] ss:$0 sm:$0xff]  ;;  %s327_s5 = smov 2  }
  0x16   :  { %282 = vmatpush3.bf16.msk.msra.mxu1 %vm281_vm4, %v280_v8  ;;  %v252_v17 = vld [vmem:[%s403_s4] ss:$0 sm:$0xff] }
  0x18   :  { %267 = vmatmul.mubr.msk.f32.vlgmr.msra.gmra.mrb[0].mxu0 %vm45_vm1, %v35_v5 }
  0x94   :  { %v210_v16 = vpop.permute.xlu0 %209 }
  0x95   :  { %v218_v18 = vmul.f32 %v255_v15, %v210_v16 }
  0xeb   :  { %v115_v11 = vpop.f32.mrb[0].mxu0 }
  0xec   :  { %v116_v12 = vadd.f32 %v250_v10, %v115_v11  ;;  %v268_v13 = vpop.f32.mrb[1].mxu0 }
  0xee   :  { %v119_v14 = vmax.f32 %v116_v12, 0.0 }
  0xf0   :  { %274 = vmatmul.mubr.msk.f32.vlgmr.msra.gmra.mrb[0].mxu1 %vm129_vm5, %v119_v14 }
 0x1c3   :  { %v203_v19 = vpop.f32.mrb[0].mxu1 }
 0x1c4   :  { %v204_v20 = vadd.f32 %v252_v17, %v203_v19  ;;  %v275_v21 = vpop.f32.mrb[1].mxu1 }
 0x1c6   :  { %v219_v22 = vadd.f32 %v218_v18, %v204_v20 }
 0x1c8   :  { %v220_v23 = vmul.f32 1.442695, %v219_v22 }
 0x1ca   :  { %292 = vpow2.f32 %v220_v23 }
 0x1d4   :  { %v293_v24 = vpop.eup %292 }
 0x1d5   :  { %v222_v25 = vadd.f32 1.0, %v293_v24 }
 0x1d7   :  { %294 = vrcp.f32 %v222_v25 }
 0x1e1   :  { %v295_v26 = vpop.eup %294 }
 0x1e2   :  { %231 = vrot.lane.b32.xlu1 %v295_v26, %s326_s2  ;;  %v225_v27 = vsub.f32 1.0, %v295_v26 }
 0x1e4   :  { %227 = vrot.lane.b32.xlu0 %v225_v27, %s326_s2 }
 0x1e6   :  { %234 = vrot.lane.b32.xlu1 %v225_v27, %s327_s5 }
 0x254   :  { %v232_v28 = vpop.permute.xlu1 %231 }
 0x256   :  { %v228_v29 = vpop.permute.xlu0 %227 }
 0x257   :  { %v238_v30 = vsel %vm237_vm6, %v295_v26, %v228_v29 }
 0x258   :  { %v235_v31 = vpop.permute.xlu1 %234  ;;  %v240_v32 = vsel %vm239_vm7, %v238_v30, %v232_v28 }
 0x259   :  { %v242_v33 = vsel %vm241_vm8, %v240_v32, %v235_v31 }
 0x25a   :  { %244 = vst.msk [vmem:[%s405_s6] sm:$0xff] %vm243_vm9, %v242_v33 }
 0x25b   :  { %249 = vsyncpa [#allocation3], 1 }

</bundles_post_ra>
